<compile_context>
chip_gen: v7x
topology: tpu7x:2x2x1
jax: 0.10.0
libtpu: 0.0.40
codegen_flags: <defaults>
</compile_context>

<pallas_src>
import functools

import jax
import jax.numpy as jnp
import numpy as np
from jax.experimental import pallas as pl
from jax.experimental.pallas import tpu as pltpu


_LOG_LO = float(np.log(1e-8))
_LOG_HI = float(np.log1p(-1e-8))

_STREAM_BYTES_PER_STEP = 2 * 1024 * 1024   # ~2 MiB of preds+targets per step
_VMEM_MODEL_BUDGET = 16 * 1024 * 1024      # conservative modeled footprint
_VMEM_LIMIT_BYTES = 48 * 1024 * 1024       # <= v7x 64 MiB physical VMEM


def _round_up(x, m):
    return (x + m - 1) // m * m


def _backward_nll_kernel(preds_ref, tgt_ref, ss_ref, binv_ref, out_ref, *,
                         n_rows, fold_rows, num_groups, num_classes):
    # preds_ref: (FR, L)  folded predictions, L = G*C lanes       (VMEM)
    # tgt_ref:   (FR, G)  folded int32 targets                    (VMEM)
    # ss_ref:    (L, L)   kron(I_G, ones(C,C)) -- resident        (VMEM)
    # binv_ref:  (L, L)   kron(I_G, invT)      -- resident        (VMEM)
    # out_ref:   (1, L)   this tile's lane-dense partial sums     (VMEM)
    g, c = num_groups, num_classes
    l = g * c
    i = pl.program_id(0)

    p = preds_ref[...].astype(jnp.float32)                        # (FR, L)

    # Per-original-row sums, broadcast back to every lane of the row's group,
    # via one MXU matmul with the block-of-ones matrix (exact select+sum).
    gsum = jnp.dot(p, ss_ref[...], preferred_element_type=jnp.float32,
                   precision=jax.lax.Precision.HIGHEST)           # (FR, L)

    # preds /= sum ; clamp(1e-8, 1-1e-8) ; log   ==  clip(log p - log sum).
    log_p = jnp.log(p) - jnp.log(gsum)
    log_p = jnp.clip(log_p, _LOG_LO, _LOG_HI)

    # Zero out lanes whose original row is padding (wrapper pad to a multiple
    # of G, or the partial last grid block) BEFORE anything is accumulated.
    # Lane j of folded row r is original row (i*FR + r)*G + j//C, valid iff
    # j < C * (n_rows - (i*FR + r)*G).
    row_i = jax.lax.broadcasted_iota(jnp.int32, (fold_rows, 1), 0)
    lane_i = jax.lax.broadcasted_iota(jnp.int32, (1, l), 1)
    lanes_valid = (n_rows - (i * fold_rows + row_i) * g) * c      # (FR, 1)
    log_p = jnp.where(lane_i < lanes_valid, log_p, 0.0)

    # Folded one-hot: OH[r, gg*C + targets[r, gg]] = 1 for each group gg.
    tgt = tgt_ref[...]                                            # (FR, G)
    oh = jnp.zeros((fold_rows, l), jnp.float32)
    for gg in range(g):
        t_gg = tgt[:, gg:gg + 1]                                  # (FR, 1)
        oh = oh + jnp.where(lane_i == t_gg + gg * c, 1.0, 0.0)

    # reweighted_targets = one_hot @ inverse_transitions, block-diagonal
    # folded form; HIGHEST keeps the f32 invT entries exact (pure selection).
    rew = jnp.dot(oh, binv_ref[...], preferred_element_type=jnp.float32,
                  precision=jax.lax.Precision.HIGHEST)            # (FR, L)

    # Lane-dense per-tile partial of sum(reweighted * log_preds); the sign,
    # the cross-tile reduce and the /N happen in the wrapper.
    out_ref[...] = jnp.sum(rew * log_p, axis=0, keepdims=True)    # (1, L)


def backward_nll_loss(preds, targets, inverse_transitions, reduction="mean",
                      fold_rows=None):
    """Pallas implementation of BackwardNLLLoss.forward (mean / sum)."""
    if reduction not in ("mean", "sum"):
        raise ValueError(f"unsupported reduction: {reduction!r}")

    n, c = preds.shape
    if tuple(inverse_transitions.shape) != (c, c):
        raise ValueError("inverse_transitions must be (C, C)")

    # ---- lane folding: G rows of C classes per lane row (free reshape). ----
    g = max(1, 128 // c)
    l = g * c
    n_pad = _round_up(n, g)
    if n_pad != n:
        # Only hit when the batch is not a multiple of G; padded rows are
        # masked inside the kernel.
        preds = jnp.pad(preds, ((0, n_pad - n), (0, 0)))
        targets = jnp.pad(targets, ((0, n_pad - n),))
    nf = n_pad // g
    preds_f = preds.reshape(nf, l)
    targets_f = targets.astype(jnp.int32).reshape(nf, g)

    # ---- constants kept resident in VMEM (constant block index). ----
    invt = inverse_transitions.astype(jnp.float32)
    eye_g = jnp.eye(g, dtype=jnp.float32)
    ssum = jnp.kron(eye_g, jnp.ones((c, c), jnp.float32))         # (L, L)
    binv = jnp.kron(eye_g, invt)                                  # (L, L)

    # ---- tile size: bytes-targeted, VMEM-capped. ----
    if fold_rows is None:
        stream_row = l * preds_f.dtype.itemsize + g * 4           # HBM B/frow
        lane_pad = _round_up(l, 128)
        vmem_row = (2 * lane_pad * preds_f.dtype.itemsize         # preds x2buf
                    + 2 * 128 * 4                                 # tgts  x2buf
                    + 8 * lane_pad * 4)                           # f32 temps
        fr = min(_STREAM_BYTES_PER_STEP // stream_row,
                 _VMEM_MODEL_BUDGET // vmem_row)
        fr = max(8, (fr // 8) * 8)
    else:
        fr = int(fold_rows)
    fr = max(1, min(fr, nf))
    num_tiles = pl.cdiv(nf, fr)

    kernel = functools.partial(_backward_nll_kernel, n_rows=n, fold_rows=fr,
                               num_groups=g, num_classes=c)
    partials = pl.pallas_call(
        kernel,
        out_shape=jax.ShapeDtypeStruct((num_tiles, l), jnp.float32),
        grid=(num_tiles,),
        in_specs=[
            pl.BlockSpec((fr, l), lambda i: (i, 0)),              # preds tile
            pl.BlockSpec((fr, g), lambda i: (i, 0)),              # target tile
            pl.BlockSpec((l, l), lambda i: (0, 0)),               # SS resident
            pl.BlockSpec((l, l), lambda i: (0, 0)),               # B  resident
        ],
        out_specs=pl.BlockSpec((1, l), lambda i: (i, 0)),         # partials
        compiler_params=pltpu.CompilerParams(
            dimension_semantics=("parallel",),
            vmem_limit_bytes=_VMEM_LIMIT_BYTES),
    )(preds_f, targets_f, ssum, binv)

    total = -jnp.sum(partials)
    if reduction == "mean":
        return total / jnp.float32(n)
    return total


def _reference(preds, targets, inverse_transitions, reduction="mean"):
    p = preds.astype(jnp.float32)
    p = p / jnp.sum(p, axis=-1, keepdims=True)
    p = jnp.clip(p, 1e-8, 1.0 - 1e-8)
    log_p = jnp.log(p)
    rew = jnp.take(inverse_transitions.astype(jnp.float32),
                   targets.astype(jnp.int32), axis=0)
    unreduced = -jnp.sum(rew * log_p, axis=-1)
    return jnp.mean(unreduced) if reduction == "mean" else jnp.sum(unreduced)


if __name__ == "__main__":
    C = 16
    # Deterministic synthetic estimator: symmetric-noise transition matrix,
    # inverse_transitions = inv(T), T = (1-eps) I + eps/C * ones.
    eps = 0.2
    T = ((1.0 - eps) * jnp.eye(C, dtype=jnp.float32)
         + (eps / C) * jnp.ones((C, C), dtype=jnp.float32))
    inverse_transitions = jnp.linalg.inv(T).astype(jnp.float32)

    def check(n, reduction, fold_rows, key):
        k1, k2 = jax.random.split(key)
        logits = jax.random.normal(k1, (n, C), dtype=jnp.float32)
        preds = jax.nn.softmax(logits, axis=-1)
        targets = jax.random.randint(k2, (n,), 0, C, dtype=jnp.int32)
        out = backward_nll_loss(preds, targets, inverse_transitions,
                                reduction, fold_rows=fold_rows)
        out = jax.block_until_ready(out)
        ref = _reference(preds, targets, inverse_transitions, reduction)
        assert np.allclose(np.asarray(out), np.asarray(ref),
                           rtol=1e-5, atol=1e-5), (n, reduction, out, ref)

    key = jax.random.PRNGKey(0)
    k1, k2, k3 = jax.random.split(key, 3)

    # Case 1: batch=8 (one folded row, single tile), default byte-sized tiling.
    check(8, "mean", None, k1)

    # Case 2: batch=197 with a forced 8-folded-row tile: multi-step grid,
    # wrapper pad (197 % 8 != 0) and masked partial last block; both
    # reductions.
    check(197, "mean", 8, k2)
    check(197, "sum", 8, k3)

    print("KERNEL_OK")
</pallas_src>

<mosaic_0001>
module attributes {stable_mosaic.version = 11 : i64} {
  func.func @_backward_nll_kernel(%arg0: i32, %arg1: memref<1x128xf32, #tpu.memory_space<vmem>>, %arg2: memref<1x8xi32, #tpu.memory_space<vmem>>, %arg3: memref<128x128xf32, #tpu.memory_space<vmem>>, %arg4: memref<128x128xf32, #tpu.memory_space<vmem>>, %arg5: memref<1x128xf32, #tpu.memory_space<vmem>>) attributes {dimension_semantics = [#tpu.dimension_semantics<parallel>], iteration_bounds = array<i64: 1>, scalar_prefetch = 0 : i64, scratch_operands = 0 : i64, tpu.core_type = #tpu.core_type<tc>, window_params = [{transform_indices = @transform_0, window_bounds = array<i64: 1, 128>}, {transform_indices = @transform_1, window_bounds = array<i64: 1, 8>}, {pipeline_mode = #tpu.pipeline_mode<synchronous>, transform_indices = @transform_2, window_bounds = array<i64: 128, 128>}, {pipeline_mode = #tpu.pipeline_mode<synchronous>, transform_indices = @transform_3, window_bounds = array<i64: 128, 128>}, {transform_indices = @transform_4, window_bounds = array<i64: 1, 128>}]} {
    %c0 = arith.constant 0 : index
    %c0_0 = arith.constant 0 : index
    %0 = vector.load %arg1[%c0, %c0_0] : memref<1x128xf32, #tpu.memory_space<vmem>>, vector<1x128xf32>
    %c0_1 = arith.constant 0 : index
    %c0_2 = arith.constant 0 : index
    %1 = vector.load %arg3[%c0_1, %c0_2] : memref<128x128xf32, #tpu.memory_space<vmem>>, vector<128x128xf32>
    %cst = arith.constant dense<0.000000e+00> : vector<1x128xf32>
    %2 = tpu.matmul %0, %1, %cst {dimension_numbers = #tpu.dot_dimension_numbers<[1], [0], [0], [1], [0, 0, 1, 1], [], []>, precision = #tpu.contract_precision<fp32>} : vector<1x128xf32>, vector<128x128xf32>, vector<1x128xf32> -> vector<1x128xf32>
    %3 = math.log %0 : vector<1x128xf32>
    %4 = math.log %2 : vector<1x128xf32>
    %5 = arith.subf %3, %4 : vector<1x128xf32>
    %cst_3 = arith.constant -18.420681 : f32
    %cst_4 = arith.constant -9.99999993E-9 : f32
    %6 = vector.broadcast %cst_3 : f32 to vector<1x128xf32>
    %7 = arith.maximumf %6, %5 : vector<1x128xf32>
    %8 = vector.broadcast %cst_4 : f32 to vector<1x128xf32>
    %9 = arith.minimumf %8, %7 : vector<1x128xf32>
    %10 = tpu.iota {dimensions = array<i32: 0>} : vector<1x1xi32>
    %11 = tpu.iota {dimensions = array<i32: 1>} : vector<1x128xi32>
    %c1_i32 = arith.constant 1 : i32
    %12 = arith.muli %arg0, %c1_i32 : i32
    %13 = vector.broadcast %12 : i32 to vector<1x1xi32>
    %14 = arith.addi %13, %10 : vector<1x1xi32>
    %c8_i32 = arith.constant 8 : i32
    %15 = vector.broadcast %c8_i32 : i32 to vector<1x1xi32>
    %16 = arith.muli %14, %15 : vector<1x1xi32>
    %c8_i32_5 = arith.constant 8 : i32
    %17 = vector.broadcast %c8_i32_5 : i32 to vector<1x1xi32>
    %18 = arith.subi %17, %16 : vector<1x1xi32>
    %c16_i32 = arith.constant 16 : i32
    %19 = vector.broadcast %c16_i32 : i32 to vector<1x1xi32>
    %20 = arith.muli %18, %19 : vector<1x1xi32>
    %21 = vector.broadcast %20 : vector<1x1xi32> to vector<1x128xi32>
    %22 = arith.cmpi slt, %11, %21 : vector<1x128xi32>
    %cst_6 = arith.constant 0.000000e+00 : f32
    %23 = vector.broadcast %cst_6 : f32 to vector<1x128xf32>
    %24 = arith.select %22, %9, %23 : vector<1x128xi1>, vector<1x128xf32>
    %c0_7 = arith.constant 0 : index
    %c0_8 = arith.constant 0 : index
    %25 = vector.load %arg2[%c0_7, %c0_8] : memref<1x8xi32, #tpu.memory_space<vmem>>, vector<1x8xi32>
    %cst_9 = arith.constant 0.000000e+00 : f32
    %26 = vector.broadcast %cst_9 : f32 to vector<1x128xf32>
    %27 = vector.extract_strided_slice %25 {offsets = [0, 0], sizes = [1, 1], strides = [1, 1]} : vector<1x8xi32> to vector<1x1xi32>
    %c0_i32 = arith.constant 0 : i32
    %28 = vector.broadcast %c0_i32 : i32 to vector<1x1xi32>
    %29 = arith.addi %27, %28 : vector<1x1xi32>
    %30 = vector.broadcast %29 : vector<1x1xi32> to vector<1x128xi32>
    %31 = arith.cmpi eq, %11, %30 : vector<1x128xi32>
    %cst_10 = arith.constant 1.000000e+00 : f32
    %cst_11 = arith.constant 0.000000e+00 : f32
    %32 = vector.broadcast %cst_10 : f32 to vector<1x128xf32>
    %33 = vector.broadcast %cst_11 : f32 to vector<1x128xf32>
    %34 = arith.select %31, %32, %33 : vector<1x128xi1>, vector<1x128xf32>
    %35 = arith.addf %26, %34 : vector<1x128xf32>
    %36 = vector.extract_strided_slice %25 {offsets = [0, 1], sizes = [1, 1], strides = [1, 1]} : vector<1x8xi32> to vector<1x1xi32>
    %c16_i32_12 = arith.constant 16 : i32
    %37 = vector.broadcast %c16_i32_12 : i32 to vector<1x1xi32>
    %38 = arith.addi %36, %37 : vector<1x1xi32>
    %39 = vector.broadcast %38 : vector<1x1xi32> to vector<1x128xi32>
    %40 = arith.cmpi eq, %11, %39 : vector<1x128xi32>
    %cst_13 = arith.constant 1.000000e+00 : f32
    %cst_14 = arith.constant 0.000000e+00 : f32
    %41 = vector.broadcast %cst_13 : f32 to vector<1x128xf32>
    %42 = vector.broadcast %cst_14 : f32 to vector<1x128xf32>
    %43 = arith.select %40, %41, %42 : vector<1x128xi1>, vector<1x128xf32>
    %44 = arith.addf %35, %43 : vector<1x128xf32>
    %45 = vector.extract_strided_slice %25 {offsets = [0, 2], sizes = [1, 1], strides = [1, 1]} : vector<1x8xi32> to vector<1x1xi32>
    %c32_i32 = arith.constant 32 : i32
    %46 = vector.broadcast %c32_i32 : i32 to vector<1x1xi32>
    %47 = arith.addi %45, %46 : vector<1x1xi32>
    %48 = vector.broadcast %47 : vector<1x1xi32> to vector<1x128xi32>
    %49 = arith.cmpi eq, %11, %48 : vector<1x128xi32>
    %cst_15 = arith.constant 1.000000e+00 : f32
    %cst_16 = arith.constant 0.000000e+00 : f32
    %50 = vector.broadcast %cst_15 : f32 to vector<1x128xf32>
    %51 = vector.broadcast %cst_16 : f32 to vector<1x128xf32>
    %52 = arith.select %49, %50, %51 : vector<1x128xi1>, vector<1x128xf32>
    %53 = arith.addf %44, %52 : vector<1x128xf32>
    %54 = vector.extract_strided_slice %25 {offsets = [0, 3], sizes = [1, 1], strides = [1, 1]} : vector<1x8xi32> to vector<1x1xi32>
    %c48_i32 = arith.constant 48 : i32
    %55 = vector.broadcast %c48_i32 : i32 to vector<1x1xi32>
    %56 = arith.addi %54, %55 : vector<1x1xi32>
    %57 = vector.broadcast %56 : vector<1x1xi32> to vector<1x128xi32>
    %58 = arith.cmpi eq, %11, %57 : vector<1x128xi32>
    %cst_17 = arith.constant 1.000000e+00 : f32
    %cst_18 = arith.constant 0.000000e+00 : f32
    %59 = vector.broadcast %cst_17 : f32 to vector<1x128xf32>
    %60 = vector.broadcast %cst_18 : f32 to vector<1x128xf32>
    %61 = arith.select %58, %59, %60 : vector<1x128xi1>, vector<1x128xf32>
    %62 = arith.addf %53, %61 : vector<1x128xf32>
    %63 = vector.extract_strided_slice %25 {offsets = [0, 4], sizes = [1, 1], strides = [1, 1]} : vector<1x8xi32> to vector<1x1xi32>
    %c64_i32 = arith.constant 64 : i32
    %64 = vector.broadcast %c64_i32 : i32 to vector<1x1xi32>
    %65 = arith.addi %63, %64 : vector<1x1xi32>
    %66 = vector.broadcast %65 : vector<1x1xi32> to vector<1x128xi32>
    %67 = arith.cmpi eq, %11, %66 : vector<1x128xi32>
    %cst_19 = arith.constant 1.000000e+00 : f32
    %cst_20 = arith.constant 0.000000e+00 : f32
    %68 = vector.broadcast %cst_19 : f32 to vector<1x128xf32>
    %69 = vector.broadcast %cst_20 : f32 to vector<1x128xf32>
    %70 = arith.select %67, %68, %69 : vector<1x128xi1>, vector<1x128xf32>
    %71 = arith.addf %62, %70 : vector<1x128xf32>
    %72 = vector.extract_strided_slice %25 {offsets = [0, 5], sizes = [1, 1], strides = [1, 1]} : vector<1x8xi32> to vector<1x1xi32>
    %c80_i32 = arith.constant 80 : i32
    %73 = vector.broadcast %c80_i32 : i32 to vector<1x1xi32>
    %74 = arith.addi %72, %73 : vector<1x1xi32>
    %75 = vector.broadcast %74 : vector<1x1xi32> to vector<1x128xi32>
    %76 = arith.cmpi eq, %11, %75 : vector<1x128xi32>
    %cst_21 = arith.constant 1.000000e+00 : f32
    %cst_22 = arith.constant 0.000000e+00 : f32
    %77 = vector.broadcast %cst_21 : f32 to vector<1x128xf32>
    %78 = vector.broadcast %cst_22 : f32 to vector<1x128xf32>
    %79 = arith.select %76, %77, %78 : vector<1x128xi1>, vector<1x128xf32>
    %80 = arith.addf %71, %79 : vector<1x128xf32>
    %81 = vector.extract_strided_slice %25 {offsets = [0, 6], sizes = [1, 1], strides = [1, 1]} : vector<1x8xi32> to vector<1x1xi32>
    %c96_i32 = arith.constant 96 : i32
    %82 = vector.broadcast %c96_i32 : i32 to vector<1x1xi32>
    %83 = arith.addi %81, %82 : vector<1x1xi32>
    %84 = vector.broadcast %83 : vector<1x1xi32> to vector<1x128xi32>
    %85 = arith.cmpi eq, %11, %84 : vector<1x128xi32>
    %cst_23 = arith.constant 1.000000e+00 : f32
    %cst_24 = arith.constant 0.000000e+00 : f32
    %86 = vector.broadcast %cst_23 : f32 to vector<1x128xf32>
    %87 = vector.broadcast %cst_24 : f32 to vector<1x128xf32>
    %88 = arith.select %85, %86, %87 : vector<1x128xi1>, vector<1x128xf32>
    %89 = arith.addf %80, %88 : vector<1x128xf32>
    %90 = vector.extract_strided_slice %25 {offsets = [0, 7], sizes = [1, 1], strides = [1, 1]} : vector<1x8xi32> to vector<1x1xi32>
    %c112_i32 = arith.constant 112 : i32
    %91 = vector.broadcast %c112_i32 : i32 to vector<1x1xi32>
    %92 = arith.addi %90, %91 : vector<1x1xi32>
    %93 = vector.broadcast %92 : vector<1x1xi32> to vector<1x128xi32>
    %94 = arith.cmpi eq, %11, %93 : vector<1x128xi32>
    %cst_25 = arith.constant 1.000000e+00 : f32
    %cst_26 = arith.constant 0.000000e+00 : f32
    %95 = vector.broadcast %cst_25 : f32 to vector<1x128xf32>
    %96 = vector.broadcast %cst_26 : f32 to vector<1x128xf32>
    %97 = arith.select %94, %95, %96 : vector<1x128xi1>, vector<1x128xf32>
    %98 = arith.addf %89, %97 : vector<1x128xf32>
    %c0_27 = arith.constant 0 : index
    %c0_28 = arith.constant 0 : index
    %99 = vector.load %arg4[%c0_27, %c0_28] : memref<128x128xf32, #tpu.memory_space<vmem>>, vector<128x128xf32>
    %cst_29 = arith.constant dense<0.000000e+00> : vector<1x128xf32>
    %100 = tpu.matmul %98, %99, %cst_29 {dimension_numbers = #tpu.dot_dimension_numbers<[1], [0], [0], [1], [0, 0, 1, 1], [], []>, precision = #tpu.contract_precision<fp32>} : vector<1x128xf32>, vector<128x128xf32>, vector<1x128xf32> -> vector<1x128xf32>
    %101 = arith.mulf %100, %24 : vector<1x128xf32>
    %cst_30 = arith.constant dense<0.000000e+00> : vector<128xf32>
    %102 = vector.multi_reduction <add>, %101, %cst_30 [0] : vector<1x128xf32> to vector<128xf32>
    %103 = vector.shape_cast %102 : vector<128xf32> to vector<1x128xf32>
    %c0_31 = arith.constant 0 : index
    %c0_32 = arith.constant 0 : index
    %104 = vector.load %arg5[%c0_31, %c0_32] : memref<1x128xf32, #tpu.memory_space<vmem>>, vector<1x128xf32>
    tpu.vector_store %arg5[%c0_31, %c0_32], %103 {strides = array<i32>} : memref<1x128xf32, #tpu.memory_space<vmem>>, vector<1x128xf32>,
    return
  }
  func.func @transform_0(%arg0: i32) -> (i32, i32) {
    %c0_i32 = arith.constant 0 : i32
    %c0_i32_0 = arith.constant 0 : i32
    return %arg0, %c0_i32 : i32, i32
  }
  func.func @transform_1(%arg0: i32) -> (i32, i32) {
    %c0_i32 = arith.constant 0 : i32
    %c0_i32_0 = arith.constant 0 : i32
    return %arg0, %c0_i32 : i32, i32
  }
  func.func @transform_2(%arg0: i32) -> (i32, i32) {
    %c0_i32 = arith.constant 0 : i32
    %c0_i32_0 = arith.constant 0 : i32
    %c0_i32_1 = arith.constant 0 : i32
    return %c0_i32, %c0_i32_0 : i32, i32
  }
  func.func @transform_3(%arg0: i32) -> (i32, i32) {
    %c0_i32 = arith.constant 0 : i32
    %c0_i32_0 = arith.constant 0 : i32
    %c0_i32_1 = arith.constant 0 : i32
    return %c0_i32, %c0_i32_0 : i32, i32
  }
  func.func @transform_4(%arg0: i32) -> (i32, i32) {
    %c0_i32 = arith.constant 0 : i32
    %c0_i32_0 = arith.constant 0 : i32
    return %arg0, %c0_i32 : i32, i32
  }
}

</mosaic_0001>

<bundles_post_ra>
// kernel: tpu_custom_call.1
= control target key start
LH: loop header
LB: loop body
LE: loop exit
PB: predicated region body
PF: predicated region fallthrough
CT: control target
= control target key end

     0   :  { %9 = vsyncpa [#allocation3], 0  ;;  %s3352_s0 = inlined_call_operand.hbm [shape: f32[1,128], index: 0, kind: input, shape index: {}]   ;;  %s3353_s1 = inlined_call_operand.vmem [shape: s32[1,8], index: 1, kind: input, shape index: {}]   ;;  %s3354_s2 = inlined_call_operand.hbm [shape: f32[128,128], index: 2, kind: input, shape index: {}]   ;;  %s3355_s3 = inlined_call_operand.hbm [shape: f32[128,128], index: 3, kind: input, shape index: {}]   ;;  %s3356_s4 = inlined_call_operand.hbm [shape: f32[1,128], index: 4, kind: output, shape index: {}]  }
   0x1   :  { %10 = vsyncpa [#allocation6], 0 }
   0x2   :  { %11 = vsyncpa [#allocation4], 0  ;;  %s2554_s15 = smov [#allocation5]   ;;  %s2460_s19 = scalar_lea.hbm %s3354_s2, 2048 }
   0x3   :  { %s29_s16 = sshll.u32 %s2554_s15, 4  ;;  %p2461_p0 = scmp.ne.s32.totalorder %s3354_s2, %s2460_s19  ;;  %s30_s16 = int_to_ptr.vmem [resolvable:$true] %s29_s16 }
   0x4   :  { %p2464_p1 = scmp.lt.u32.totalorder %s2460_s19, %s3354_s2 }
   0x6   :  { %p2466_p2 = pnand %p2464_p1, %p2461_p0 }
   0x8   :  { %2469 = shalt.err (!%p2466_p2)
}
   0x9   :  { %s2470_s24 = scalar_lea.vmem %s30_s16, 2048  ;;  %p2475_p4 = scmp.lt.s32.totalorder %s30_s16, %s30_s16 }
   0xa   :  { %p2471_p3 = scmp.ne.s32.totalorder %s30_s16, %s2470_s24  ;;  %p2476_p5 = scmp.lt.s32.totalorder %s2470_s24, %s2470_s24 }
   0xc   :  { %p2477_p6 = por %p2476_p5, %p2475_p4 }
   0xe   :  { %p2478_p7 = pnand %p2477_p6, %p2471_p3 }
  0x10   :  { %2481 = shalt.err (!%p2478_p7)
}
  0x11   :  { %s2555_s25 = smov 128   ;;  %s2556_s26 = smov 8  }
  0x12   :  { %35 = dma.hbm_to_vmem [thread:$0]  %s3354_s2, 2048, %s30_s16, [#allocation6], %s2555_s25, %s2555_s25, %s2556_s26  }
  0x13   :  { %s2557_s29 = smov [#allocation2]   ;;  %s2558_s5 = smov [#allocation7]  }
  0x14   :  { %s18_s30 = sshll.u32 %s2557_s29, 4  ;;  %s41_s6 = sshll.u32 %s2558_s5, 4  ;;  %s19_s30 = int_to_ptr.vmem [resolvable:$true] %s18_s30  ;;  %s42_s6 = int_to_ptr.vmem [resolvable:$true] %s41_s6 }
  0x15   :  { %s2482_s9 = scalar_lea.hbm %s3352_s0, 16 }
  0x16   :  { %p2483_p8 = scmp.ne.s32.totalorder %s3352_s0, %s2482_s9  ;;  %p2486_p9 = scmp.lt.u32.totalorder %s2482_s9, %s3352_s0 }
  0x18   :  { %p2488_p10 = pnand %p2486_p9, %p2483_p8 }
  0x1a   :  { %2491 = shalt.err (!%p2488_p10)
}
  0x1b   :  { %s2492_s2 = scalar_lea.vmem %s19_s30, 16  ;;  %s2496_s14 = scalar_lea.vmem %s19_s30, 32 }
  0x1c   :  { %p2493_p11 = scmp.ne.s32.totalorder %s19_s30, %s2492_s2  ;;  %p2497_p12 = scmp.lt.s32.totalorder %s19_s30, %s19_s30 }
  0x1d   :  { %p2498_p13 = scmp.lt.s32.totalorder %s2496_s14, %s2492_s2 }
  0x1f   :  { %p2499_p0 = por %p2498_p13, %p2497_p12 }
  0x21   :  { %p2500_p1 = pnand %p2499_p0, %p2493_p11 }
  0x23   :  { %2503 = shalt.err (!%p2500_p1)
}
  0x24   :  { %21 = dma.hbm_to_vmem [thread:$0]  %s3352_s0, 16, %s19_s30, [#allocation3]  }
  0x25   :  { %s2504_s19 = scalar_lea.hbm %s3355_s3, 2048 }
  0x26   :  { %p2505_p2 = scmp.ne.s32.totalorder %s3355_s3, %s2504_s19  ;;  %p2508_p3 = scmp.lt.u32.totalorder %s2504_s19, %s3355_s3 }
  0x28   :  { %p2510_p4 = pnand %p2508_p3, %p2505_p2 }
  0x2a   :  { %2513 = shalt.err (!%p2510_p4)
}
  0x2b   :  { %s2514_s24 = scalar_lea.vmem %s42_s6, 2048  ;;  %p2519_p6 = scmp.lt.s32.totalorder %s42_s6, %s42_s6 }
  0x2c   :  { %p2515_p5 = scmp.ne.s32.totalorder %s42_s6, %s2514_s24  ;;  %p2520_p7 = scmp.lt.s32.totalorder %s2514_s24, %s2514_s24 }
  0x2e   :  { %p2521_p8 = por %p2520_p7, %p2519_p6 }
  0x30   :  { %p2522_p9 = pnand %p2521_p8, %p2515_p5 }
  0x32   :  { %2525 = shalt.err (!%p2522_p9)
}
  0x33   :  { %47 = dma.hbm_to_vmem [thread:$0]  %s3355_s3, 2048, %s42_s6, [#allocation6], %s2555_s25, %s2555_s25, %s2556_s26  }
  0x34   :  { %2548 = dma.done.wait [#allocation3], 16  }
  0x35   :  { %2549 = vsyncadd [#allocation3], 4294967280 }
  0x36   :  { %2550 = dma.done.wait [#allocation6], 4096  }
  0x37   :  { %2551 = vsyncadd [#allocation6], 4294963200  ;;  %v2559_v0 = vmov 0   ;;  %v2560_v1 = vmov 2   ;;  %v3367_v2 = vmov 0.0|0.0   ;;  %vm2562_vm0 = vmmov 0  }
  0x38   :  { %2446 = vset.pattern.permute.xlu0 %v2559_v0  ;;  %2448 = vset.pattern.permute.xlu1 %v2560_v1  ;;  %v3361_v3 = vmov 0.0   ;;  %v2647_v4 = vld [vmem:[%s3353_s1] sm:$0x1]  ;;  %v58_v5 = vld [vmem:[#allocation5] sm:$0xff]  ;;  %v59_v6 = vld [vmem:[#allocation5 + $0x8] sm:$0xff]  ;;  %v2564_v19 = vmov 1  }
  0x39   :  { %2121 = vmatprep.subr.bf16.mxu0 %v3367_v2  ;;  %2265 = vmatprep.subr.bf16.mxu1 %v3367_v2  ;;  %v755_v7 = vadd.s32 32, %v2647_v4  ;;  %v75_v8 = vand.u32 4294901760, %v58_v5  ;;  %v78_v9 = vand.u32 4294901760, %v59_v6  ;;  %v60_v10 = vld [vmem:[#allocation5 + $0x10] sm:$0xff]  ;;  %v61_v11 = vld [vmem:[#allocation5 + $0x18] sm:$0xff]  ;;  %v744_v12 = vadd.s32 16, %v2647_v4 }
  0x3a   :  { %1733 = vmatprep.mubr.msk.f32.mxu0 %vm2562_vm0, %v3361_v3  ;;  %1943 = vmatprep.mubr.msk.f32.mxu1 %vm2562_vm0, %v3361_v3  ;;  %v81_v13 = vand.u32 4294901760, %v60_v10  ;;  %v84_v14 = vand.u32 4294901760, %v61_v11  ;;  %v62_v15 = vld [vmem:[#allocation5 + $0x20] sm:$0xff]  ;;  %v63_v16 = vld [vmem:[#allocation5 + $0x28] sm:$0xff]  ;;  %v766_v18 = vadd.s32 48, %v2647_v4  ;;  %v64_v23 = vld [vmem:[#allocation5 + $0x30] sm:$0xff] }
  0x3b   :  { %735 = vperm.xlu0 %2446, %v2647_v4   ;;  %757 = vperm.xlu1 %2448, %v755_v7   ;;  %v2652_v17 = vpack.c.bf16 %v78_v9, %v75_v8  ;;  %v87_v21 = vand.u32 4294901760, %v62_v15  ;;  %v90_v22 = vand.u32 4294901760, %v63_v16  ;;  %v65_v24 = vld [vmem:[#allocation5 + $0x38] sm:$0xff]  ;;  %v2565_v25 = vmov 3   ;;  %v66_v29 = vld [vmem:[#allocation5 + $0x40] sm:$0xff]  ;;  %v67_v30 = vld [vmem:[#allocation5 + $0x48] sm:$0xff] }
  0x3c   :  { %v2656_v20 = vpack.c.bf16 %v84_v14, %v81_v13  ;;  %v788_v26 = vadd.s32 80, %v2647_v4  ;;  %v93_v27 = vand.u32 4294901760, %v64_v23  ;;  %v96_v28 = vand.u32 4294901760, %v65_v24  ;;  %v57_v33 = vld [vmem:[#allocation2] sm:$0x1]  ;;  %v68_v38 = vld [vmem:[#allocation5 + $0x50] sm:$0xff] }
  0x3d   :  { %3418 = vst [vmem:[#allocation12_spill] sm:$0xff] %v2652_v17  ;;  %2123 = vmatpush3.bf16.msra.mxu0 %v2652_v17  ;;  %v777_v31 = vadd.s32 64, %v2647_v4  ;;  %v2662_v32 = vpack.c.bf16 %v90_v22, %v87_v21  ;;  %v2664_v34 = vsub.f32 %v58_v5, %v75_v8  ;;  %v2666_v35 = vsub.f32 %v59_v6, %v78_v9  ;;  %v69_v39 = vld [vmem:[#allocation5 + $0x58] sm:$0xff]  ;;  %v70_v53 = vld [vmem:[#allocation5 + $0x60] sm:$0xff]  ;;  %v71_v54 = vld [vmem:[#allocation5 + $0x68] sm:$0xff]  ;;  %s2570_s1 = smov [#allocation8]  }
  0x3e   :  { %3419 = vst [vmem:[#allocation13_spill] sm:$0xff] %v2656_v20  ;;  %2124 = vmatprep.subr.bf16.mxu0 %v3367_v2  ;;  %v2668_v36 = vsub.f32 %v60_v10, %v81_v13  ;;  %v2566_v37 = vmov 5   ;;  %v2671_v40 = vsub.f32 %v61_v11, %v84_v14  ;;  %v2673_v41 = vsub.f32 %v62_v15, %v87_v21  ;;  %v72_v5 = vld [vmem:[#allocation5 + $0x70] sm:$0xff]  ;;  %s1487_s26 = sshll.u32 %s2570_s1, 4  ;;  %s1488_s26 = int_to_ptr.vmem [resolvable:$true] %s1487_s26 }
  0x3f   :  { %2447 = vset.pattern.permute.xlu0 %v2564_v19  ;;  %2449 = vset.pattern.permute.xlu1 %v2565_v25  ;;  %3420 = vst [vmem:[#allocation14_spill] sm:$0xff] %v2662_v32  ;;  %v99_v42 = vand.u32 4294901760, %v66_v29  ;;  %v102_v43 = vand.u32 4294901760, %v67_v30  ;;  %v2567_v44 = vmov 4   ;;  %v2675_v45 = vsub.f32 %v63_v16, %v90_v22  ;;  %v73_v16 = vld [vmem:[#allocation5 + $0x78] sm:$0xff]  ;;  %s2526_s28 = scalar_lea.vmem %s1488_s26, 16  ;;  %p2531_p11 = scmp.lt.s32.totalorder %s1488_s26, %s1488_s26 }
  0x40   :  { %746 = vperm.xlu0 %2447, %v744_v12   ;;  %768 = vperm.xlu1 %2449, %v766_v18   ;;  %v2677_v46 = vpack.c.bf16 %v96_v28, %v93_v27  ;;  %v799_v47 = vadd.s32 96, %v2647_v4  ;;  %v2680_v48 = vand.u32 4294901760, %v57_v33  ;;  %v2683_v49 = vsub.f32 %v64_v23, %v93_v27  ;;  %p2527_p10 = scmp.ne.s32.totalorder %s1488_s26, %s2526_s28  ;;  %s2530_s29 = scalar_lea.vmem %s1488_s26, 32 }
  0x41   :  { %2126 = vmatpush3.bf16.msra.mxu0 %v2656_v20  ;;  %v2685_v50 = vsub.f32 %v65_v24, %v96_v28  ;;  %v105_v51 = vand.u32 4294901760, %v68_v38  ;;  %v108_v52 = vand.u32 4294901760, %v69_v39  ;;  %v2688_v55 = vsub.f32 %v66_v29, %v99_v42  ;;  %p2532_p12 = scmp.lt.s32.totalorder %s2530_s29, %s2526_s28 }
  0x42   :  { %2127 = vmatprep.subr.bf16.mxu0 %v3367_v2  ;;  %3421 = vst [vmem:[#allocation15_spill] sm:$0xff] %v2677_v46  ;;  %v810_v56 = vadd.s32 112, %v2647_v4  ;;  %v168_v57 = vand.u32 4294901760, %v2664_v34  ;;  %v175_v58 = vand.u32 4294901760, %v2666_v35  ;;  %v2693_v59 = vpack.c.bf16 %v102_v43, %v99_v42 }
  0x43   :  { %v2696_v60 = vsub.f32 %v57_v33, %v2680_v48  ;;  %v182_v61 = vand.u32 4294901760, %v2668_v36  ;;  %v189_v62 = vand.u32 4294901760, %v2671_v40  ;;  %v2568_v63 = vmov 7   ;;  %p2533_p13 = por %p2532_p12, %p2531_p11 }
  0x44   :  { %2451 = vset.pattern.permute.xlu0 %v2566_v37  ;;  %2450 = vset.pattern.permute.xlu1 %v2567_v44  ;;  %3422 = vst [vmem:[#allocation16_spill] sm:$0xff] %v2693_v59  ;;  %v111_v0 = vand.u32 4294901760, %v70_v53  ;;  %v114_v1 = vand.u32 4294901760, %v71_v54  ;;  %v196_v4 = vand.u32 4294901760, %v2673_v41  ;;  %v203_v6 = vand.u32 4294901760, %v2675_v45 }
  0x45   :  { %790 = vperm.xlu0 %2451, %v788_v26   ;;  %779 = vperm.xlu1 %2450, %v777_v31   ;;  %3423 = vst [vmem:[#allocation17_spill] sm:$0xff] %v2696_v60  ;;  %v2569_v7 = vmov 6   ;;  %v2703_v8 = vsub.f32 %v67_v30, %v102_v43  ;;  %v2705_v9 = vpack.c.bf16 %v108_v52, %v105_v51  ;;  %v210_v11 = vand.u32 4294901760, %v2683_v49  ;;  %p2534_p0 = pnand %p2533_p13, %p2527_p10 }
  0x46   :  { %2129 = vmatpush3.bf16.msra.mxu0 %v2662_v32  ;;  %v2707_v10 = vsub.f32 %v68_v38, %v105_v51  ;;  %v2711_v12 = vsub.f32 %v69_v39, %v108_v52  ;;  %v169_v13 = vsub.f32 %v2664_v34, %v168_v57  ;;  %v176_v14 = vsub.f32 %v2666_v35, %v175_v58 }
  0x47   :  { %2130 = vmatprep.subr.bf16.mxu0 %v3367_v2  ;;  %3424 = vst [vmem:[#allocation18_spill] sm:$0xff] %v2705_v9  ;;  %v217_v15 = vand.u32 4294901760, %v2685_v50  ;;  %v117_v18 = vand.u32 4294901760, %v72_v5  ;;  %v3357_v19 = vand.u32 4294901760, %v2696_v60  ;;  %v183_v21 = vsub.f32 %v2668_v36, %v182_v61 }
  0x48   :  { %3425 = vst [vmem:[#allocation19_spill] sm:$0xff] %v2707_v10  ;;  %3426 = vst [vmem:[#allocation20_spill] sm:$0xff] %v2711_v12  ;;  %v190_v22 = vsub.f32 %v2671_v40, %v189_v62  ;;  %v2727_v23 = vpack.c.bf16 %v114_v1, %v111_v0  ;;  %v197_v24 = vsub.f32 %v2673_v41, %v196_v4  ;;  %v3364_v26 = vand.u32 4294901760, %v2688_v55 }
  0x49   :  { %2454 = vset.pattern.permute.xlu0 %v2568_v63  ;;  %2452 = vset.pattern.permute.xlu1 %v2569_v7  ;;  %v204_v25 = vsub.f32 %v2675_v45, %v203_v6  ;;  %v2737_v27 = vsub.f32 %v70_v53, %v111_v0  ;;  %v2739_v28 = vsub.f32 %v71_v54, %v114_v1  ;;  %v120_v31 = vand.u32 4294901760, %v73_v16 }
  0x4a   :  { %2132 = vmatpush3.bf16.msra.mxu0 %v2677_v46  ;;  %801 = vperm.xlu1 %2452, %v799_v47   ;;  %3427 = vst [vmem:[#allocation21_spill] sm:$0xff] %v2727_v23  ;;  %v211_v29 = vsub.f32 %v2683_v49, %v210_v11  ;;  %v218_v30 = vsub.f32 %v2685_v50, %v217_v15  ;;  %v170_v37 = vand.u32 4294901760, %v169_v13  ;;  %v177_v38 = vand.u32 4294901760, %v176_v14 }
  0x4b   :  { %2133 = vmatprep.subr.bf16.mxu0 %v3367_v2  ;;  %3428 = vst [vmem:[#allocation22_spill] sm:$0xff] %v2737_v27  ;;  %3429 = vst [vmem:[#allocation23_spill] sm:$0xff] %v2739_v28  ;;  %v2748_v33 = vsub.f32 %v72_v5, %v117_v18  ;;  %v2753_v39 = vsub.f32 %v2696_v60, %v3357_v19  ;;  %v184_v42 = vand.u32 4294901760, %v183_v21  ;;  %v191_v43 = vand.u32 4294901760, %v190_v22  ;;  %v821_v22 = vld [vmem:[#allocation7] sm:$0xff]  ;;  %v826_v19 = vld [vmem:[#allocation7 + $0x28] sm:$0xff] }
  0x4c   :  { %v3363_v44 = vand.u32 4294901760, %v2703_v8  ;;  %v198_v47 = vand.u32 4294901760, %v197_v24  ;;  %v205_v51 = vand.u32 4294901760, %v204_v25  ;;  %v2759_v52 = vsub.f32 %v2688_v55, %v3364_v26  ;;  %v822_v24 = vld [vmem:[#allocation7 + $0x8] sm:$0xff] }
  0x4d   :  { %v3360_v53 = vand.u32 4294901760, %v2707_v10  ;;  %v212_v54 = vand.u32 4294901760, %v211_v29  ;;  %v3358_v0 = vand.u32 4294901760, %v2737_v27  ;;  %v2766_v1 = vpack.c.bf16 %v120_v31, %v117_v18 }
  0x4e   :  { %2135 = vmatpush3.bf16.msra.mxu0 %v2693_v59  ;;  %2453 = vset.pattern.permute.xlu1 %v2568_v63  ;;  %v3359_v63 = vand.u32 4294901760, %v2711_v12  ;;  %v2768_v5 = vsub.f32 %v73_v16, %v120_v31  ;;  %v159_v7 = vand.u32 4294901760, %v2753_v39  ;;  %v2146_v13 = vpack.c.bf16 %v177_v38, %v170_v37  ;;  %v824_v31 = vld [vmem:[#allocation7 + $0x18] sm:$0xff] }
  0x4f   :  { %2136 = vmatprep.subr.bf16.mxu0 %v3367_v2  ;;  %812 = vperm.xlu1 %2453, %v810_v56   ;;  %v219_v56 = vand.u32 4294901760, %v218_v30  ;;  %3430 = vst [vmem:[#allocation24_spill] sm:$0xff] %v2766_v1  ;;  %v2771_v14 = vpack.c.bf16 %v191_v43, %v184_v42  ;;  %v2776_v21 = vsub.f32 %v2703_v8, %v3363_v44  ;;  %v823_v30 = vld [vmem:[#allocation7 + $0x10] sm:$0xff]  ;;  %v825_v43 = vld [vmem:[#allocation7 + $0x20] sm:$0xff]  ;;  %v847_v18 = vand.u32 4294901760, %v824_v31 }
  0x50   :  { %v2778_v25 = vpack.c.bf16 %v205_v51, %v198_v47  ;;  %v2784_v16 = vsub.f32 %v2707_v10, %v3360_v53  ;;  %v2793_v38 = vsub.f32 %v2711_v12, %v3359_v63  ;;  %v2798_v39 = vsub.f32 %v2737_v27, %v3358_v0 }
  0x51   :  { %v2788_v37 = vpack.c.bf16 %v219_v56, %v212_v54  ;;  %v2806_v47 = vpack.c.bf16 %v175_v58, %v168_v57  ;;  %v838_v51 = vand.u32 4294901760, %v821_v22  ;;  %v841_v54 = vand.u32 4294901760, %v822_v24  ;;  %v827_v57 = vld [vmem:[#allocation7 + $0x30] sm:$0xff]  ;;  %v828_v58 = vld [vmem:[#allocation7 + $0x38] sm:$0xff] }
  0x52   :  { %2138 = vmatpush3.bf16.msra.mxu0 %v2705_v9  ;;  %v2812_v56 = vpack.c.bf16 %v189_v62, %v182_v61  ;;  %v844_v42 = vand.u32 4294901760, %v823_v30  ;;  %v2819_v0 = vpack.c.bf16 %v203_v6, %v196_v4  ;;  %v850_v61 = vand.u32 4294901760, %v825_v43  ;;  %v829_v62 = vld [vmem:[#allocation7 + $0x40] sm:$0xff]  ;;  %v830_v6 = vld [vmem:[#allocation7 + $0x48] sm:$0xff] }
  0x53   :  { %2139 = vmatprep.subr.bf16.mxu0 %v3367_v2  ;;  %3431 = vst [vmem:[#allocation25_spill] sm:$0xff] %v2806_v47  ;;  %v2821_v63 = vpack.c.bf16 %v841_v54, %v838_v51  ;;  %v2823_v53 = vsub.f32 %v821_v22, %v838_v51  ;;  %v2825_v3 = vsub.f32 %v822_v24, %v841_v54  ;;  %v853_v4 = vand.u32 4294901760, %v826_v19 }
  0x54   :  { %3432 = vst [vmem:[#allocation26_spill] sm:$0xff] %v2812_v56  ;;  %3433 = vst [vmem:[#allocation27_spill] sm:$0xff] %v2819_v0  ;;  %v2828_v29 = vpack.c.bf16 %v847_v18, %v844_v42  ;;  %v2830_v44 = vsub.f32 %v823_v30, %v844_v42  ;;  %v2832_v26 = vsub.f32 %v824_v31, %v847_v18  ;;  %v856_v51 = vand.u32 4294901760, %v827_v57  ;;  %v2844_v30 = vld [vmem:[#allocation7 + $0x50] sm:$0xff]  ;;  %v2846_v18 = vld [vmem:[#allocation7 + $0x58] sm:$0xff] }
  0x55   :  { %3434 = vst [vmem:[#allocation28_spill] sm:$0xff] %v2821_v63  ;;  %2267 = vmatpush3.bf16.msra.mxu1 %v2821_v63  ;;  %v2836_v22 = vsub.f32 %v825_v43, %v850_v61  ;;  %v2842_v24 = vpack.c.bf16 %v217_v15, %v210_v11  ;;  %v859_v54 = vand.u32 4294901760, %v828_v58  ;;  %v2850_v42 = vsub.f32 %v826_v19, %v853_v4  ;;  %v2858_v15 = vld [vmem:[#allocation7 + $0x60] sm:$0xff] }
  0x56   :  { %2141 = vmatpush3.bf16.msra.mxu0 %v2727_v23  ;;  %3435 = vst [vmem:[#allocation29_spill] sm:$0xff] %v2828_v29  ;;  %2268 = vmatprep.subr.bf16.mxu1 %v3367_v2  ;;  %v3437_v43 = vand.u32 4294901760, %v2688_v55  ;;  %v3438_v63 = vand.u32 4294901760, %v2703_v8  ;;  %v862_v11 = vand.u32 4294901760, %v829_v62  ;;  %v2861_v56 = vsub.f32 %v827_v57, %v856_v51 }
  0x57   :  { %2142 = vmatprep.subr.bf16.mxu0 %v3367_v2  ;;  %3436 = vst [vmem:[#allocation30_spill] sm:$0xff] %v2842_v24  ;;  %v2863_v47 = vsub.f32 %v828_v58, %v859_v54  ;;  %v865_v31 = vand.u32 4294901760, %v830_v6  ;;  %v3441_v19 = vmov 0.0   ;;  %v868_v57 = vand.u32 4294901760, %v2844_v30  ;;  %v2879_v24 = vld [vmem:[#allocation7 + $0x70] sm:$0xff] }
  0x58   :  { %v2856_v0 = vpack.c.bf16 %v3438_v63, %v3437_v43  ;;  %v3442_v63 = vand.u32 4294901760, %v2707_v10  ;;  %v3443_v43 = vand.u32 4294901760, %v2711_v12  ;;  %v871_v58 = vand.u32 4294901760, %v2846_v18 }
  0x59   :  { %3440 = vst [vmem:[#allocation32_spill] sm:$0xff] %v2863_v47  ;;  %2270 = vmatpush3.bf16.msra.mxu1 %v2828_v29  ;;  %v2887_v23 = vsub.f32 %v830_v6, %v865_v31  ;;  %v3447_v9 = vand.u32 4294901760, %v2737_v27  ;;  %v3394_v20 = vand.u32 4294901760, %v2825_v3  ;;  %v3457_v10 = vand.u32 4294901760, %v2776_v21 }
  0x5a   :  { %2144 = vmatpush3.bf16.msra.mxu0 %v2766_v1  ;;  %3439 = vst [vmem:[#allocation31_spill] sm:$0xff] %v2856_v0  ;;  %v2869_v1 = vsub.f32 %v829_v62, %v862_v11  ;;  %v2881_v0 = vld [vmem:[#allocation7 + $0x78] sm:$0xff]  ;;  %v2885_v62 = vpack.c.bf16 %v853_v4, %v850_v61  ;;  %v2903_v61 = vsub.f32 %v2844_v30, %v868_v57 }
  0x5b   :  { %2145 = vmatprep.subr.bf16.mxu0 %v3367_v2  ;;  %v2865_v2 = vld [vmem:[#allocation7 + $0x68] sm:$0xff]  ;;  %v2906_v4 = vsub.f32 %v2846_v18, %v871_v58  ;;  %v3387_v30 = vand.u32 4294901760, %v2881_v0  ;;  %v2923_v18 = vpack.c.bf16 %v859_v54, %v856_v51  ;;  %v3397_v54 = vand.u32 4294901760, %v2830_v44 }
  0x5c   :  { %3446 = vst [vmem:[#allocation34_spill] sm:$0xff] %v2885_v62  ;;  %v3388_v6 = vand.u32 4294901760, %v2865_v2 }
  0x5d   :  { %1734 = vmatmul.mubr.f32.vlgmr.msra.gmra.mrb[0].mxu0 %v159_v7  ;;  %v2875_v7 = vpack.c.bf16 %v3443_v43, %v3442_v63  ;;  %v3448_v63 = vand.u32 4294901760, %v2739_v28  ;;  %3454 = vst [vmem:[#allocation37_spill] sm:$0xff] %v2923_v18  ;;  %v2944_v51 = vsub.f32 %v2881_v0, %v3387_v30  ;;  %v946_v30 = vsub.f32 %v2830_v44, %v3397_v54 }
  0x5e   :  { %2147 = vmatpush3.bf16.msra.mxu0 %v2146_v13  ;;  %1768 = vmatprep.mubr.msk.f32.mxu0 %vm2562_vm0, %v3441_v19  ;;  %v3445_v13 = vmov 0.0|0.0   ;;  %v2928_v32 = vsub.f32 %v2865_v2, %v3388_v6  ;;  %v3405_v6 = vand.u32 4294901760, %v2850_v42 }
  0x5f   :  { %3444 = vst [vmem:[#allocation33_spill] sm:$0xff] %v2875_v7  ;;  %2148 = vmatprep.subr.bf16.mxu0 %v3445_v13  ;;  %v2893_v43 = vpack.c.bf16 %v3448_v63, %v3447_v9  ;;  %v3383_v7 = vand.u32 4294901760, %v2858_v15  ;;  %v3450_v59 = vmov %v3448_v63  ;;  %2271 = vmatprep.subr.bf16.mxu1 %v3445_v13  ;;  %v3451_v63 = vand.u32 4294901760, %v2748_v33 }
  0x60   :  { %v2899_v46 = vsub.f32 %v2739_v28, %v3450_v59  ;;  %v3452_v59 = vand.u32 4294901760, %v2768_v5  ;;  %2273 = vmatpush3.bf16.msra.mxu1 %v2885_v62  ;;  %v3406_v62 = vand.u32 4294901760, %v2861_v56  ;;  %v947_v54 = vand.u32 4294901760, %v946_v30 }
  0x61   :  { %3449 = vst [vmem:[#allocation35_spill] sm:$0xff] %v2893_v43  ;;  %v2912_v9 = vsub.f32 %v2858_v15, %v3383_v7  ;;  %v3386_v43 = vand.u32 4294901760, %v2879_v24  ;;  %v3391_v7 = vand.u32 4294901760, %v2823_v53  ;;  %2274 = vmatprep.subr.bf16.mxu1 %v3445_v13 }
  0x62   :  { %v2918_v29 = vpack.c.bf16 %v3452_v59, %v3451_v63  ;;  %2150 = vmatpush3.bf16.msra.mxu0 %v2771_v14  ;;  %v2934_v63 = vpack.c.bf16 %v865_v31, %v862_v11  ;;  %v939_v31 = vsub.f32 %v2825_v3, %v3394_v20  ;;  %v3398_v11 = vand.u32 4294901760, %v2832_v26 }
  0x63   :  { %2151 = vmatprep.subr.bf16.mxu0 %v3445_v13  ;;  %v2939_v14 = vsub.f32 %v2879_v24, %v3386_v43  ;;  %v932_v59 = vsub.f32 %v2823_v53, %v3391_v7  ;;  %v3399_v43 = vand.u32 4294901760, %v2836_v22 }
  0x64   :  { %3453 = vst [vmem:[#allocation36_spill] sm:$0xff] %v2918_v29  ;;  %v940_v17 = vand.u32 4294901760, %v939_v31  ;;  %v953_v20 = vsub.f32 %v2832_v26, %v3398_v11  ;;  %2276 = vmatpush3.bf16.msra.mxu1 %v2923_v18  ;;  %v967_v29 = vsub.f32 %v2850_v42, %v3405_v6  ;;  %v247_v11 = vand.u32 4294901760, %v2793_v38 }
  0x65   :  { %v933_v7 = vand.u32 4294901760, %v932_v59  ;;  %v960_v60 = vsub.f32 %v2836_v22, %v3399_v43  ;;  %v3455_v59 = vand.u32 4294901760, %v2863_v47  ;;  %2277 = vmatprep.subr.bf16.mxu1 %v3445_v13  ;;  %v3417_v6 = vand.u32 4294901760, %v2869_v1 }
  0x66   :  { %2153 = vmatpush3.bf16.msra.mxu0 %v2778_v25  ;;  %v974_v25 = vsub.f32 %v2861_v56, %v3406_v62  ;;  %v954_v18 = vand.u32 4294901760, %v953_v20  ;;  %v968_v28 = vand.u32 4294901760, %v967_v29  ;;  %v3456_v62 = vand.u32 4294901760, %v2759_v52 }
  0x67   :  { %2154 = vmatprep.subr.bf16.mxu0 %v3445_v13  ;;  %v981_v31 = vsub.f32 %v2863_v47, %v3455_v59  ;;  %v2982_v43 = vpack.c.bf16 %v940_v17, %v933_v7  ;;  %v961_v30 = vand.u32 4294901760, %v960_v60  ;;  %v2990_v47 = vpack.c.bf16 %v871_v58, %v868_v57 }
  0x68   :  { %v975_v27 = vand.u32 4294901760, %v974_v25  ;;  %v2158_v59 = vpack.c.bf16 %v3457_v10, %v3456_v62  ;;  %v2992_v38 = vpack.c.bf16 %v954_v18, %v947_v54  ;;  %v3416_v17 = vand.u32 4294901760, %v2887_v23  ;;  %2279 = vmatpush3.bf16.msra.mxu1 %v2934_v63 }
  0x69   :  { %v982_v12 = vand.u32 4294901760, %v981_v31  ;;  %v2997_v20 = vpack.c.bf16 %v968_v28, %v961_v30  ;;  %v988_v52 = vsub.f32 %v2869_v1, %v3417_v6  ;;  %v254_v10 = vand.u32 4294901760, %v2798_v39  ;;  %2280 = vmatprep.subr.bf16.mxu1 %v3445_v13 }
  0x6a   :  { %2156 = vmatpush3.bf16.msra.mxu0 %v2788_v37  ;;  %v995_v21 = vsub.f32 %v2887_v23, %v3416_v17  ;;  %v3458_v29 = vand.u32 4294901760, %v2748_v33  ;;  %v3459_v7 = vand.u32 4294901760, %v2784_v16  ;;  %v261_v39 = vand.u32 4294901760, %v2899_v46 }
  0x6b   :  { %2157 = vmatprep.subr.bf16.mxu0 %v3445_v13  ;;  %v2999_v60 = vpack.c.bf16 %v982_v12, %v975_v27  ;;  %v989_v28 = vand.u32 4294901760, %v988_v52  ;;  %v3415_v12 = vand.u32 4294901760, %v2903_v61  ;;  %v3414_v27 = vand.u32 4294901760, %v2906_v4 }
  0x6c   :  { %v267_v37 = vsub.f32 %v2748_v33, %v3458_v29  ;;  %v2161_v57 = vpack.c.bf16 %v247_v11, %v3459_v7  ;;  %v3460_v58 = vand.u32 4294901760, %v2768_v5  ;;  %v996_v18 = vand.u32 4294901760, %v995_v21  ;;  %2282 = vmatpush3.bf16.msra.mxu1 %v2990_v47 }
  0x6d   :  { %v3461_v54 = vand.u32 4294901760, %v2858_v15  ;;  %v3462_v25 = vand.u32 4294901760, %v2865_v2  ;;  %v1002_v16 = vsub.f32 %v2903_v61, %v3415_v12  ;;  %v1009_v46 = vsub.f32 %v2906_v4, %v3414_v27  ;;  %2283 = vmatprep.subr.bf16.mxu1 %v3445_v13 }
  0x6e   :  { %2159 = vmatpush3.bf16.msra.mxu0 %v2158_v59  ;;  %v274_v62 = vsub.f32 %v2768_v5, %v3460_v58  ;;  %v3035_v11 = vpack.c.bf16 %v996_v18, %v989_v28  ;;  %v3413_v15 = vand.u32 4294901760, %v2912_v9  ;;  %v3412_v2 = vand.u32 4294901760, %v2928_v32 }
  0x6f   :  { %2160 = vmatprep.subr.bf16.mxu0 %v3445_v13  ;;  %v3026_v31 = vpack.c.bf16 %v3462_v25, %v3461_v54  ;;  %v1003_v30 = vand.u32 4294901760, %v1002_v16  ;;  %v1010_v59 = vand.u32 4294901760, %v1009_v46  ;;  %v2164_v52 = vpack.c.bf16 %v261_v39, %v254_v10 }
  0x70   :  { %v268_v21 = vand.u32 4294901760, %v267_v37  ;;  %v275_v29 = vand.u32 4294901760, %v274_v62  ;;  %v3463_v7 = vand.u32 4294901760, %v2879_v24  ;;  %v3464_v58 = vand.u32 4294901760, %v2881_v0 }
  0x71   :  { %2285 = vmatpush3.bf16.msra.mxu1 %v3026_v31  ;;  %v3047_v28 = vpack.c.bf16 %v1010_v59, %v1003_v30  ;;  %v1016_v18 = vsub.f32 %v2912_v9, %v3413_v15  ;;  %v1023_v10 = vsub.f32 %v2928_v32, %v3412_v2  ;;  %v3411_v37 = vand.u32 4294901760, %v2939_v14  ;;  %v3480_v2 = vld [vmem:[#allocation25_spill] sm:$0xff] }
  0x72   :  { %2162 = vmatpush3.bf16.msra.mxu0 %v2161_v57  ;;  %v3043_v54 = vpack.c.bf16 %v3464_v58, %v3463_v7  ;;  %2286 = vmatprep.subr.bf16.mxu1 %v3445_v13  ;;  %v3410_v57 = vand.u32 4294901760, %v2944_v51  ;;  %v2167_v39 = vpack.c.bf16 %v275_v29, %v268_v21  ;;  %v2170_v59 = vpack.c.bf16 %v2666_v35, %v2664_v34  ;;  %v3466_v58 = vld [vmem:[#allocation19_spill] sm:$0xff] }
  0x73   :  { %2163 = vmatprep.subr.bf16.mxu0 %v3445_v13  ;;  %v1017_v24 = vand.u32 4294901760, %v1016_v18  ;;  %v1024_v0 = vand.u32 4294901760, %v1023_v10  ;;  %v1030_v25 = vsub.f32 %v2939_v14, %v3411_v37  ;;  %v2173_v21 = vpack.c.bf16 %v2671_v40, %v2668_v36  ;;  %v3467_v18 = vld [vmem:[#allocation20_spill] sm:$0xff] }
  0x74   :  { %v1037_v16 = vsub.f32 %v2944_v51, %v3410_v57  ;;  %v2314_v29 = vpack.c.bf16 %v2825_v3, %v2823_v53  ;;  %v2176_v34 = vpack.c.bf16 %v2675_v45, %v2673_v41  ;;  %v2317_v35 = vpack.c.bf16 %v2832_v26, %v2830_v44  ;;  %v3465_v41 = vld [vmem:[#allocation32_spill] sm:$0xff] }
  0x75   :  { %2288 = vmatpush3.bf16.msra.mxu1 %v3043_v54  ;;  %v3060_v62 = vpack.c.bf16 %v1024_v0, %v1017_v24  ;;  %v1031_v46 = vand.u32 4294901760, %v1030_v25  ;;  %v2179_v36 = vpack.c.bf16 %v2685_v50, %v2683_v49  ;;  %v2320_v40 = vpack.c.bf16 %v2850_v42, %v2836_v22  ;;  %v3468_v50 = vld [vmem:[#allocation22_spill] sm:$0xff]  ;;  %v3469_v24 = vld [vmem:[#allocation23_spill] sm:$0xff] }
  0x76   :  { %2165 = vmatpush3.bf16.msra.mxu0 %v2164_v52  ;;  %2289 = vmatprep.subr.bf16.mxu1 %v3445_v13  ;;  %v1038_v30 = vand.u32 4294901760, %v1037_v16  ;;  %v2182_v7 = vpack.c.bf16 %v2703_v8, %v2688_v55  ;;  %v2323_v45 = vpack.c.bf16 %v3465_v41, %v2861_v56  ;;  %v2185_v10 = vpack.c.bf16 %v3467_v18, %v3466_v58  ;;  %v3470_v16 = vld [vmem:[#allocation17_spill] sm:$0xff] }
  0x77   :  { %2166 = vmatprep.subr.bf16.mxu0 %v3445_v13  ;;  %v2326_v49 = vpack.c.bf16 %v2887_v23, %v2869_v1  ;;  %v2188_v0 = vpack.c.bf16 %v3469_v24, %v3468_v50  ;;  %v2329_v55 = vpack.c.bf16 %v2906_v4, %v2903_v61  ;;  %v2191_v8 = vpack.c.bf16 %v2768_v5, %v2748_v33  ;;  %v3472_v33 = vld [vmem:[#allocation13_spill] sm:$0xff]  ;;  %v3473_v5 = vld [vmem:[#allocation14_spill] sm:$0xff]  ;;  %v3478_v50 = vld [vmem:[#allocation24_spill] sm:$0xff] }
  0x78   :  { %v3072_v52 = vpack.c.bf16 %v1038_v30, %v1031_v46  ;;  %v2335_v25 = vpack.c.bf16 %v2944_v51, %v2939_v14  ;;  %v3471_v46 = vld [vmem:[#allocation12_spill] sm:$0xff]  ;;  %v3474_v30 = vld [vmem:[#allocation15_spill] sm:$0xff]  ;;  %v3479_v57 = vand.u32 4294901760, %v3470_v16 }
  0x7a   :  { %2168 = vmatpush3.bf16.msra.mxu0 %v2167_v39  ;;  %v2332_v39 = vpack.c.bf16 %v2928_v32, %v2912_v9 }
  0x7b   :  { %2169 = vmatprep.subr.bf16.mxu0 %v3445_v13 }
  0x7d   :  { %1769 = vmatmul.mubr.f32.vlgmr.msra.gmra.mrb[0].mxu0 %v2680_v48 }
  0x7e   :  { %2171 = vmatpush3.bf16.msra.mxu0 %v2170_v59  ;;  %1803 = vmatprep.mubr.msk.f32.mxu0 %vm2562_vm0, %v3441_v19  ;;  %v3475_v59 = vld [vmem:[#allocation16_spill] sm:$0xff] }
  0x7f   :  { %2172 = vmatprep.subr.bf16.mxu0 %v3445_v13 }
  0x82   :  { %2174 = vmatpush3.bf16.msra.mxu0 %v2173_v21  ;;  %v722_v21 = vlaneseq }
  0x83   :  { %2175 = vmatprep.subr.bf16.mxu0 %v3445_v13 }
  0x84   :  { %v3136_v24 = vand.u32 127, %v722_v21 }
  0x86   :  { %2177 = vmatpush3.bf16.msra.mxu0 %v2176_v34  ;;  %v3476_v34 = vld [vmem:[#allocation18_spill] sm:$0xff] }
  0x87   :  { %2178 = vmatprep.subr.bf16.mxu0 %v3445_v13 }
  0x8a   :  { %2180 = vmatpush3.bf16.msra.mxu0 %v2179_v36  ;;  %v3130_v36 = vshrl.u32 %v722_v21, 7 }
  0x8b   :  { %2181 = vmatprep.subr.bf16.mxu0 %v3445_v13 }
  0x8c   :  { %v739_v58 = vsub.s32 0, %v3130_v36 }
  0x8e   :  { %2183 = vmatpush3.bf16.msra.mxu0 %v2182_v7  ;;  %v3477_v7 = vld [vmem:[#allocation21_spill] sm:$0xff] }
  0x8f   :  { %2184 = vmatprep.subr.bf16.mxu0 %v3445_v13 }
  0x92   :  { %2186 = vmatpush3.bf16.msra.mxu0 %v2185_v10 }
  0x93   :  { %2187 = vmatprep.subr.bf16.mxu0 %v3445_v13 }
  0x96   :  { %2189 = vmatpush3.bf16.msra.mxu0 %v2188_v0 }
  0x97   :  { %2190 = vmatprep.subr.bf16.mxu0 %v3445_v13 }
  0x9a   :  { %2192 = vmatpush3.bf16.msra.mxu0 %v2191_v8 }
  0x9b   :  { %2193 = vmatprep.subr.bf16.mxu0 %v3445_v13 }
  0x9d   :  { %1804 = vmatmul.mubr.f32.vlgmr.msra.gmra.mrb[0].mxu0 %v3470_v16 }
  0x9e   :  { %2195 = vmatpush3.bf16.msra.mxu0 %v3471_v46  ;;  %1838 = vmatprep.mubr.msk.f32.mxu0 %vm2562_vm0, %v3441_v19 }
  0x9f   :  { %2196 = vmatprep.subr.bf16.mxu0 %v3445_v13 }
  0xa2   :  { %2198 = vmatpush3.bf16.msra.mxu0 %v3472_v33 }
  0xa3   :  { %2199 = vmatprep.subr.bf16.mxu0 %v3445_v13 }
  0xa6   :  { %2201 = vmatpush3.bf16.msra.mxu0 %v3473_v5 }
  0xa7   :  { %2202 = vmatprep.subr.bf16.mxu0 %v3445_v13 }
  0xaa   :  { %2204 = vmatpush3.bf16.msra.mxu0 %v3474_v30 }
  0xab   :  { %2205 = vmatprep.subr.bf16.mxu0 %v3445_v13 }
  0xae   :  { %2207 = vmatpush3.bf16.msra.mxu0 %v3475_v59 }
  0xaf   :  { %2208 = vmatprep.subr.bf16.mxu0 %v3445_v13 }
  0xb2   :  { %2210 = vmatpush3.bf16.msra.mxu0 %v3476_v34 }
  0xb3   :  { %2211 = vmatprep.subr.bf16.mxu0 %v3445_v13 }
  0xb6   :  { %2213 = vmatpush3.bf16.msra.mxu0 %v3477_v7 }
  0xb7   :  { %2214 = vmatprep.subr.bf16.mxu0 %v3445_v13 }
  0xba   :  { %v736_v18 = vpop.permute.xlu0 %735  ;;  %2216 = vmatpush3.bf16.msra.mxu0 %v3478_v50  ;;  %v758_v0 = vpop.permute.xlu1 %757 }
  0xbb   :  { %v740_v10 = vrot.slane %v736_v18, %v739_v58  ;;  %2217 = vmatprep.subr.bf16.mxu0 %v3445_v13  ;;  %v762_v8 = vrot.slane %v758_v0, %v739_v58 }
  0xbd   :  { %vm741_vm1 = vcmp.eq.s32.totalorder %v3136_v24, %v740_v10  ;;  %1839 = vmatmul.mubr.f32.vlgmr.msra.gmra.mrb[0].mxu0 %v3479_v57  ;;  %vm763_vm2 = vcmp.eq.s32.totalorder %v3136_v24, %v762_v8  ;;  %v3481_v57 = vld [vmem:[#allocation26_spill] sm:$0xff] }
  0xbe   :  { %2219 = vmatpush3.bf16.msra.mxu0 %v3480_v2  ;;  %1873 = vmatprep.mubr.msk.f32.mxu0 %vm2562_vm0, %v3441_v19  ;;  %v742_v21 = vsel %vm741_vm1, 1.0, %v3441_v19 }
  0xbf   :  { %v747_v37 = vpop.permute.xlu0 %746  ;;  %2220 = vmatprep.subr.bf16.mxu0 %v3445_v13  ;;  %v769_v15 = vpop.permute.xlu1 %768 }
  0xc0   :  { %v751_v18 = vrot.slane %v747_v37, %v739_v58  ;;  %v773_v10 = vrot.slane %v769_v15, %v739_v58  ;;  %v764_v37 = vsel %vm763_vm2, 1.0, %v3441_v19 }
  0xc2   :  { %vm752_vm3 = vcmp.eq.s32.totalorder %v3136_v24, %v751_v18  ;;  %2222 = vmatpush3.bf16.msra.mxu0 %v3481_v57  ;;  %vm774_vm4 = vcmp.eq.s32.totalorder %v3136_v24, %v773_v10  ;;  %v3482_v18 = vld [vmem:[#allocation27_spill] sm:$0xff]  ;;  %v3483_v57 = vld [vmem:[#allocation30_spill] sm:$0xff] }
  0xc3   :  { %v753_v16 = vsel %vm752_vm3, 1.0, %v3441_v19  ;;  %2223 = vmatprep.subr.bf16.mxu0 %v3445_v13  ;;  %v775_v8 = vsel %vm774_vm4, 1.0, %v3441_v19 }
  0xc4   :  { %v754_v0 = vadd.f32 %v753_v16, %v742_v21  ;;  %v791_v2 = vpop.permute.xlu0 %790  ;;  %v780_v17 = vpop.permute.xlu1 %779 }
  0xc5   :  { %v795_v27 = vrot.slane %v791_v2, %v739_v58  ;;  %v784_v6 = vrot.slane %v780_v17, %v739_v58 }
  0xc6   :  { %v765_v12 = vadd.f32 %v764_v37, %v754_v0  ;;  %2225 = vmatpush3.bf16.msra.mxu0 %v3482_v18  ;;  %v3485_v18 = vld [vmem:[#allocation33_spill] sm:$0xff] }
  0xc7   :  { %2226 = vmatprep.subr.bf16.mxu0 %v3445_v13  ;;  %vm785_vm5 = vcmp.eq.s32.totalorder %v3136_v24, %v784_v6  ;;  %vm796_vm6 = vcmp.eq.s32.totalorder %v3136_v24, %v795_v27 }
  0xc8   :  { %v776_v15 = vadd.f32 %v775_v8, %v765_v12  ;;  %v786_v21 = vsel %vm785_vm5, 1.0, %v3441_v19  ;;  %v797_v0 = vsel %vm796_vm6, 1.0, %v3441_v19  ;;  %v3484_v12 = vld [vmem:[#allocation31_spill] sm:$0xff] }
  0xc9   :  { %v802_v16 = vpop.permute.xlu1 %801 }
  0xca   :  { %v787_v10 = vadd.f32 %v786_v21, %v776_v15  ;;  %2228 = vmatpush3.bf16.msra.mxu0 %v3483_v57  ;;  %v806_v2 = vrot.slane %v802_v16, %v739_v58 }
  0xcb   :  { %2229 = vmatprep.subr.bf16.mxu0 %v3445_v13 }
  0xcc   :  { %vm807_vm7 = vcmp.eq.s32.totalorder %v3136_v24, %v806_v2  ;;  %v798_v17 = vadd.f32 %v797_v0, %v787_v10  ;;  %v3486_v10 = vld [vmem:[#allocation35_spill] sm:$0xff] }
  0xcd   :  { %v808_v6 = vsel %vm807_vm7, 1.0, %v3441_v19 }
  0xce   :  { %2231 = vmatpush3.bf16.msra.mxu0 %v3484_v12  ;;  %v813_v37 = vpop.permute.xlu1 %812  ;;  %v809_v8 = vadd.f32 %v808_v6, %v798_v17 }
  0xcf   :  { %2232 = vmatprep.subr.bf16.mxu0 %v3445_v13  ;;  %v817_v27 = vrot.slane %v813_v37, %v739_v58  ;;  %v3487_v58 = vld [vmem:[#allocation36_spill] sm:$0xff] }
  0xd1   :  { %vm818_vm8 = vcmp.eq.s32.totalorder %v3136_v24, %v817_v27 }
  0xd2   :  { %2234 = vmatpush3.bf16.msra.mxu0 %v3485_v18  ;;  %v819_v15 = vsel %vm818_vm8, 1.0, %v3441_v19 }
  0xd3   :  { %2235 = vmatprep.subr.bf16.mxu0 %v3445_v13  ;;  %v820_v21 = vadd.f32 %v819_v15, %v809_v8 }
  0xd5   :  { %v3171_v16 = vand.u32 4294901760, %v820_v21 }
  0xd6   :  { %2237 = vmatpush3.bf16.msra.mxu0 %v3486_v10 }
  0xd7   :  { %2238 = vmatprep.subr.bf16.mxu0 %v3445_v13  ;;  %v3176_v57 = vsub.f32 %v820_v21, %v3171_v16 }
  0xd9   :  { %v920_v0 = vand.u32 4294901760, %v3176_v57 }
  0xda   :  { %2240 = vmatpush3.bf16.msra.mxu0 %v3487_v58 }
  0xdb   :  { %2241 = vmatprep.subr.bf16.mxu0 %v3445_v13  ;;  %v921_v2 = vsub.f32 %v3176_v57, %v920_v0 }
  0xdd   :  { %1874 = vmatmul.mubr.f32.vlgmr.msra.gmra.mrb[0].mxu0 %v2680_v48  ;;  %v922_v17 = vand.u32 4294901760, %v921_v2 }
  0xde   :  { %2243 = vmatpush3.bf16.msra.mxu0 %v3471_v46  ;;  %1908 = vmatprep.mubr.msk.f32.mxu0 %vm2562_vm0, %v3441_v19 }
  0xdf   :  { %2244 = vmatprep.subr.bf16.mxu0 %v3445_v13  ;;  %1944 = vmatmul.mubr.f32.vlgmr.msra.gmra.mrb[0].mxu1 %v922_v17 }
  0xe0   :  { %2291 = vmatpush3.bf16.msra.mxu1 %v2982_v43  ;;  %1978 = vmatprep.mubr.msk.f32.mxu1 %vm2562_vm0, %v3441_v19  ;;  %v3489_v43 = vld [vmem:[#allocation29_spill] sm:$0xff] }
  0xe1   :  { %2292 = vmatprep.subr.bf16.mxu1 %v3445_v13 }
  0xe2   :  { %2246 = vmatpush3.bf16.msra.mxu0 %v3472_v33 }
  0xe3   :  { %2247 = vmatprep.subr.bf16.mxu0 %v3445_v13 }
  0xe4   :  { %2294 = vmatpush3.bf16.msra.mxu1 %v2992_v38  ;;  %v3490_v38 = vld [vmem:[#allocation34_spill] sm:$0xff] }
  0xe5   :  { %2295 = vmatprep.subr.bf16.mxu1 %v3445_v13 }
  0xe6   :  { %2249 = vmatpush3.bf16.msra.mxu0 %v3473_v5 }
  0xe7   :  { %2250 = vmatprep.subr.bf16.mxu0 %v3445_v13 }
  0xe8   :  { %2297 = vmatpush3.bf16.msra.mxu1 %v2997_v20  ;;  %v3491_v20 = vld [vmem:[#allocation37_spill] sm:$0xff] }
  0xe9   :  { %2298 = vmatprep.subr.bf16.mxu1 %v3445_v13 }
  0xea   :  { %2252 = vmatpush3.bf16.msra.mxu0 %v3474_v30 }
  0xeb   :  { %2253 = vmatprep.subr.bf16.mxu0 %v3445_v13 }
  0xec   :  { %2300 = vmatpush3.bf16.msra.mxu1 %v2999_v60  ;;  %v3492_v60 = vand.u32 4294901760, %v2823_v53  ;;  %v3497_v53 = vand.u32 4294901760, %v2850_v42  ;;  %v3503_v42 = vand.u32 4294901760, %v2906_v4 }
  0xed   :  { %2301 = vmatprep.subr.bf16.mxu1 %v3445_v13 }
  0xee   :  { %2255 = vmatpush3.bf16.msra.mxu0 %v3475_v59 }
  0xef   :  { %2256 = vmatprep.subr.bf16.mxu0 %v3445_v13 }
  0xf0   :  { %2303 = vmatpush3.bf16.msra.mxu1 %v3035_v11  ;;  %v3493_v11 = vand.u32 4294901760, %v2825_v3  ;;  %v3496_v3 = vand.u32 4294901760, %v2836_v22  ;;  %v3502_v22 = vand.u32 4294901760, %v2903_v61  ;;  %v2459_v61 = vld [vmem:[#allocation2] sm:$0x1] }
  0xf1   :  { %2304 = vmatprep.subr.bf16.mxu1 %v3445_v13  ;;  %2455 = vlog2.f32 %v2459_v61 }
  0xf2   :  { %2258 = vmatpush3.bf16.msra.mxu0 %v3476_v34 }
  0xf3   :  { %2259 = vmatprep.subr.bf16.mxu0 %v3445_v13 }
  0xf4   :  { %2306 = vmatpush3.bf16.msra.mxu1 %v3047_v28  ;;  %v2362_v28 = vpack.c.bf16 %v3493_v11, %v3492_v60 }
  0xf5   :  { %2307 = vmatprep.subr.bf16.mxu1 %v3445_v13 }
  0xf6   :  { %2261 = vmatpush3.bf16.msra.mxu0 %v3477_v7 }
  0xf7   :  { %2262 = vmatprep.subr.bf16.mxu0 %v3445_v13 }
  0xf8   :  { %2309 = vmatpush3.bf16.msra.mxu1 %v3060_v62  ;;  %v3494_v62 = vand.u32 4294901760, %v2830_v44  ;;  %v3499_v44 = vand.u32 4294901760, %v3465_v41  ;;  %v3505_v41 = vand.u32 4294901760, %v2928_v32 }
  0xf9   :  { %2310 = vmatprep.subr.bf16.mxu1 %v3445_v13 }
  0xfa   :  { %2264 = vmatpush3.bf16.msra.mxu0 %v3478_v50 }
  0xfb   :  { %v2456_v4 = vpop.eup %2455 }
  0xfc   :  { %2312 = vmatpush3.bf16.msra.mxu1 %v3072_v52  ;;  %v3495_v52 = vand.u32 4294901760, %v2832_v26 }
  0xfd   :  { %1909 = vmatmul.mubr.f32.vlgmr.msra.gmra.mrb[0].mxu0 %v2680_v48  ;;  %2313 = vmatprep.subr.bf16.mxu1 %v3445_v13  ;;  %v3488_v48 = vld [vmem:[#allocation28_spill] sm:$0xff] }
  0xff   :  { %1979 = vmatmul.mubr.f32.vlgmr.msra.gmra.mrb[0].mxu1 %v3171_v16 }
 0x100   :  { %2315 = vmatpush3.bf16.msra.mxu1 %v2314_v29  ;;  %2013 = vmatprep.mubr.msk.f32.mxu1 %vm2562_vm0, %v3441_v19  ;;  %v2365_v29 = vpack.c.bf16 %v3495_v52, %v3494_v62 }
 0x101   :  { %2316 = vmatprep.subr.bf16.mxu1 %v3445_v13 }
 0x104   :  { %2318 = vmatpush3.bf16.msra.mxu1 %v2317_v35  ;;  %v2368_v35 = vpack.c.bf16 %v3497_v53, %v3496_v3 }
 0x105   :  { %2319 = vmatprep.subr.bf16.mxu1 %v3445_v13 }
 0x108   :  { %2321 = vmatpush3.bf16.msra.mxu1 %v2320_v40  ;;  %v3498_v40 = vand.u32 4294901760, %v2861_v56  ;;  %v3504_v56 = vand.u32 4294901760, %v2912_v9 }
 0x109   :  { %2322 = vmatprep.subr.bf16.mxu1 %v3445_v13 }
 0x10a   :  { %v2371_v26 = vpack.c.bf16 %v3499_v44, %v3498_v40 }
 0x10c   :  { %2324 = vmatpush3.bf16.msra.mxu1 %v2323_v45  ;;  %v3500_v45 = vand.u32 4294901760, %v2869_v1  ;;  %v3507_v1 = vand.u32 4294901760, %v2944_v51 }
 0x10d   :  { %2325 = vmatprep.subr.bf16.mxu1 %v3445_v13 }
 0x110   :  { %2327 = vmatpush3.bf16.msra.mxu1 %v2326_v49  ;;  %v3501_v49 = vand.u32 4294901760, %v2887_v23  ;;  %v3506_v23 = vand.u32 4294901760, %v2939_v14  ;;  %v716_v14 = vmul.f32 0.6931472, %v2456_v4 }
 0x111   :  { %2328 = vmatprep.subr.bf16.mxu1 %v3445_v13 }
 0x112   :  { %v2383_v46 = vpack.c.bf16 %v3507_v1, %v3506_v23 }
 0x114   :  { %2330 = vmatpush3.bf16.msra.mxu1 %v2329_v55  ;;  %v2374_v55 = vpack.c.bf16 %v3501_v49, %v3500_v45 }
 0x115   :  { %2331 = vmatprep.subr.bf16.mxu1 %v3445_v13 }
 0x118   :  { %2333 = vmatpush3.bf16.msra.mxu1 %v2332_v39  ;;  %v2377_v39 = vpack.c.bf16 %v3503_v42, %v3502_v22 }
 0x119   :  { %2334 = vmatprep.subr.bf16.mxu1 %v3445_v13 }
 0x11c   :  { %2336 = vmatpush3.bf16.msra.mxu1 %v2335_v25  ;;  %v2380_v25 = vpack.c.bf16 %v3505_v41, %v3504_v56 }
 0x11d   :  { %2337 = vmatprep.subr.bf16.mxu1 %v3445_v13 }
 0x11f   :  { %2014 = vmatmul.mubr.f32.vlgmr.msra.gmra.mrb[0].mxu1 %v3176_v57 }
 0x120   :  { %2339 = vmatpush3.bf16.msra.mxu1 %v3488_v48  ;;  %2048 = vmatprep.mubr.msk.f32.mxu1 %vm2562_vm0, %v3441_v19 }
 0x121   :  { %2340 = vmatprep.subr.bf16.mxu1 %v3445_v13 }
 0x124   :  { %2342 = vmatpush3.bf16.msra.mxu1 %v3489_v43 }
 0x125   :  { %2343 = vmatprep.subr.bf16.mxu1 %v3445_v13 }
 0x128   :  { %2345 = vmatpush3.bf16.msra.mxu1 %v3490_v38 }
 0x129   :  { %2346 = vmatprep.subr.bf16.mxu1 %v3445_v13 }
 0x12c   :  { %2348 = vmatpush3.bf16.msra.mxu1 %v3491_v20 }
 0x12d   :  { %2349 = vmatprep.subr.bf16.mxu1 %v3445_v13 }
 0x130   :  { %2351 = vmatpush3.bf16.msra.mxu1 %v2934_v63 }
 0x131   :  { %2352 = vmatprep.subr.bf16.mxu1 %v3445_v13 }
 0x134   :  { %2354 = vmatpush3.bf16.msra.mxu1 %v2990_v47 }
 0x135   :  { %2355 = vmatprep.subr.bf16.mxu1 %v3445_v13 }
 0x138   :  { %2357 = vmatpush3.bf16.msra.mxu1 %v3026_v31 }
 0x139   :  { %2358 = vmatprep.subr.bf16.mxu1 %v3445_v13 }
 0x13c   :  { %2360 = vmatpush3.bf16.msra.mxu1 %v3043_v54 }
 0x13d   :  { %2361 = vmatprep.subr.bf16.mxu1 %v3445_v13 }
 0x13f   :  { %2049 = vmatmul.mubr.f32.vlgmr.msra.gmra.mrb[0].mxu1 %v920_v0 }
 0x140   :  { %2363 = vmatpush3.bf16.msra.mxu1 %v2362_v28  ;;  %2083 = vmatprep.mubr.msk.f32.mxu1 %vm2562_vm0, %v3441_v19 }
 0x141   :  { %2364 = vmatprep.subr.bf16.mxu1 %v3445_v13 }
 0x144   :  { %2366 = vmatpush3.bf16.msra.mxu1 %v2365_v29 }
 0x145   :  { %2367 = vmatprep.subr.bf16.mxu1 %v3445_v13 }
 0x148   :  { %2369 = vmatpush3.bf16.msra.mxu1 %v2368_v35 }
 0x149   :  { %2370 = vmatprep.subr.bf16.mxu1 %v3445_v13 }
 0x14c   :  { %2372 = vmatpush3.bf16.msra.mxu1 %v2371_v26 }
 0x14d   :  { %2373 = vmatprep.subr.bf16.mxu1 %v3445_v13 }
 0x150   :  { %2375 = vmatpush3.bf16.msra.mxu1 %v2374_v55 }
 0x151   :  { %2376 = vmatprep.subr.bf16.mxu1 %v3445_v13 }
 0x154   :  { %2378 = vmatpush3.bf16.msra.mxu1 %v2377_v39 }
 0x155   :  { %2379 = vmatprep.subr.bf16.mxu1 %v3445_v13 }
 0x158   :  { %2381 = vmatpush3.bf16.msra.mxu1 %v2380_v25 }
 0x159   :  { %2382 = vmatprep.subr.bf16.mxu1 %v3445_v13 }
 0x15c   :  { %2384 = vmatpush3.bf16.msra.mxu1 %v2383_v46 }
 0x15d   :  { %2385 = vmatprep.subr.bf16.mxu1 %v3445_v13 }
 0x15f   :  { %2084 = vmatmul.mubr.f32.vlgmr.msra.gmra.mrb[0].mxu1 %v3171_v16 }
 0x160   :  { %2387 = vmatpush3.bf16.msra.mxu1 %v3488_v48  ;;  %2118 = vmatprep.mubr.msk.f32.mxu1 %vm2562_vm0, %v3441_v19 }
 0x161   :  { %2388 = vmatprep.subr.bf16.mxu1 %v3445_v13 }
 0x164   :  { %2390 = vmatpush3.bf16.msra.mxu1 %v3489_v43 }
 0x165   :  { %2391 = vmatprep.subr.bf16.mxu1 %v3445_v13 }
 0x168   :  { %2393 = vmatpush3.bf16.msra.mxu1 %v3490_v38 }
 0x169   :  { %2394 = vmatprep.subr.bf16.mxu1 %v3445_v13 }
 0x16c   :  { %2396 = vmatpush3.bf16.msra.mxu1 %v3491_v20 }
 0x16d   :  { %2397 = vmatprep.subr.bf16.mxu1 %v3445_v13 }
 0x170   :  { %2399 = vmatpush3.bf16.msra.mxu1 %v2934_v63 }
 0x171   :  { %2400 = vmatprep.subr.bf16.mxu1 %v3445_v13 }
 0x174   :  { %2402 = vmatpush3.bf16.msra.mxu1 %v2990_v47  ;;  %v728_v47 = vmul.u32 8, %v3130_v36 }
 0x175   :  { %2403 = vmatprep.subr.bf16.mxu1 %v3445_v13 }
 0x176   :  { %v729_v33 = vsub.s32 8, %v728_v47 }
 0x178   :  { %2405 = vmatpush3.bf16.msra.mxu1 %v3026_v31  ;;  %v730_v5 = vmul.u32 16, %v729_v33 }
 0x179   :  { %2406 = vmatprep.subr.bf16.mxu1 %v3445_v13 }
 0x17a   :  { %vm731_vm9 = vcmp.lt.s32.totalorder %v3136_v24, %v730_v5 }
 0x17c   :  { %2408 = vmatpush3.bf16.msra.mxu1 %v3043_v54 }
 0x17f   :  { %2119 = vmatmul.mubr.f32.vlgmr.msra.gmra.mrb[0].mxu1 %v3171_v16 }
 0x1d0   :  { %v711_v32 = vpop.f32.mrb[0].mxu0 }
 0x1d1   :  { %v1910_v19 = vpop.f32.mrb[1].mxu0  ;;  %2457 = vlog2.f32 %v711_v32 }
 0x1db   :  { %v2458_v9 = vpop.eup %2457 }
 0x1dc   :  { %v718_v63 = vmul.f32 0.6931472, %v2458_v9 }
 0x1de   :  { %v719_v51 = vsub.f32 %v716_v14, %v718_v63 }
 0x1e0   :  { %v720_v31 = vmax.f32 %v719_v51, -18.420681 }
 0x1e2   :  { %v721_v13 = vmin.f32 %v720_v31, -1e-08 }
 0x1e4   :  { %v732_v54 = vsel %vm731_vm9, %v721_v13, 0.0 }
 0x252   :  { %v1474_v30 = vpop.f32.mrb[0].mxu1 }
 0x253   :  { %v1478_v59 = vmul.f32 %v1474_v30, %v732_v54  ;;  %v2120_v34 = vpop.f32.mrb[1].mxu1 }
 0x255   :  { %1480 = vst [vmem:[#allocation8] sm:$0x1] %v1478_v59 }
 0x256   :  { %2537 = shalt.err (!%p2534_p0)
}
 0x257   :  { %s2538_s6 = scalar_lea.hbm %s3356_s4, 16 }
 0x258   :  { %p2539_p1 = scmp.ne.s32.totalorder %s3356_s4, %s2538_s6  ;;  %p2542_p2 = scmp.lt.u32.totalorder %s2538_s6, %s3356_s4 }
 0x25a   :  { %p2544_p3 = pnand %p2542_p2, %p2539_p1 }
 0x25c   :  { %2547 = shalt.err (!%p2544_p3)
}
 0x25d   :  { %1490 = dma.vmem_to_hbm [thread:$0]  %s1488_s26, 16, %s3356_s4, [#allocation4]  }
 0x25e   :  { %2552 = dma.done.wait [#allocation4], 16  }
 0x25f   :  { %2553 = vsyncadd [#allocation4], 4294967280 }
 0x260   :  { %1494 = vsyncpa [#allocation3], 1 }
 0x261   :  { %1495 = vsyncpa [#allocation6], 1 }
 0x262   :  { %1496 = vsyncpa [#allocation4], 1 }

</bundles_post_ra>
